<compile_context>
chip_gen: v7x
topology: tpu7x:2x2x1
jax: 0.10.0
libtpu: 0.0.40
codegen_flags: <defaults>
</compile_context>

<pallas_src>
import math
import jax
import jax.numpy as jnp
from jax.experimental import pallas as pl
from jax.experimental.pallas import tpu as pltpu


# ---------------------------------------------------------------------------
# Parameter / buffer construction (plain JAX glue, mirrors __init__)
# ---------------------------------------------------------------------------
def build_vision_rope_freqs(dim, pt_seq_len, ft_seq_len=None, theta=10000.0,
                            freqs_for="lang", max_freq=10, num_freqs=1):
    if ft_seq_len is None:
        ft_seq_len = pt_seq_len

    if freqs_for == "lang":
        freqs = 1.0 / (theta ** (jnp.arange(0, dim, 2)[: dim // 2]
                                 .astype(jnp.float32) / dim))
    elif freqs_for == "pixel":
        freqs = jnp.linspace(1.0, max_freq / 2.0, dim // 2) * math.pi
    elif freqs_for == "constant":
        freqs = jnp.ones((num_freqs,), jnp.float32)
    else:
        raise ValueError(freqs_for)

    t = jnp.arange(ft_seq_len, dtype=jnp.float32) / ft_seq_len * pt_seq_len
    freqs = jnp.einsum("i,f->if", t, freqs)            # (ft, dim//2)
    freqs = jnp.repeat(freqs, 2, axis=-1)              # '... n -> ... (n r)', r=2

    # broadcat((freqs[:, None, :], freqs[None, :, :]), dim=-1)
    ft = ft_seq_len
    a = jnp.broadcast_to(freqs[:, None, :], (ft, ft, freqs.shape[-1]))
    b = jnp.broadcast_to(freqs[None, :, :], (ft, ft, freqs.shape[-1]))
    freqs2d = jnp.concatenate([a, b], axis=-1)         # (ft, ft, 2*dim)

    D = freqs2d.shape[-1]
    freqs_cos = jnp.cos(freqs2d).reshape(-1, D)        # (ft*ft, 2*dim)
    freqs_sin = jnp.sin(freqs2d).reshape(-1, D)
    return freqs_cos, freqs_sin


# ---------------------------------------------------------------------------
# Pallas kernel: out = x*cos + roll(x,-1)*sin_a + roll(x,+1)*sin_b
#   roll(x,-1)[j] = x[j+1]  -> used at even j  (sin_a[j] = -sin[j] there, else 0)
#   roll(x,+1)[j] = x[j-1]  -> used at odd  j  (sin_b[j] = +sin[j] there, else 0)
# which reproduces t*cos + rotate_half(t)*sin for interleaved pairs exactly.
# ---------------------------------------------------------------------------
def _rope_kernel(t_ref, cos_ref, sina_ref, sinb_ref, o_ref):
    x = t_ref[...].astype(jnp.float32)          # (bm, tn)
    tn = x.shape[-1]
    rot_to_even = pltpu.roll(x, tn - 1, 1)      # == roll by -1: x[j+1] lands at j
    rot_to_odd = pltpu.roll(x, 1, 1)            # x[j-1] lands at j
    out = (x * cos_ref[...]
           + rot_to_even * sina_ref[...]
           + rot_to_odd * sinb_ref[...])
    o_ref[...] = out.astype(o_ref.dtype)


def _pick_block(total, target, align):
    """Largest multiple of `align` that divides `total` and is <= target, else full."""
    if total <= target:
        return total
    b = (min(target, total) // align) * align
    while b >= align:
        if total % b == 0:
            return b
        b -= align
    return total


def vision_rope_apply(t, freqs_cos, freqs_sin, *,
                      row_block_target=256, col_block_target=2048):
    """Applies the rotary embedding.  t: (..., N, D);  cos/sin: (N, D)."""
    # TODO(synk): patch_indices_keep gather branch (per-batch dynamic patch
    # selection) is not implemented; only the default forward path is.
    *lead, N, D = t.shape
    assert freqs_cos.shape == (N, D) and freqs_sin.shape == (N, D)
    assert D % 2 == 0
    M = math.prod(lead) if lead else 1
    W = N * D

    t2 = t.reshape(M, W)

    # Fold rotate_half's sign and pair-parity select into two masked sin tables.
    cos = freqs_cos.reshape(1, W).astype(jnp.float32)
    sin = freqs_sin.reshape(W).astype(jnp.float32)
    even = (jnp.arange(W) % 2) == 0
    sin_a = jnp.where(even, -sin, 0.0).reshape(1, W)   # coeff of roll(x, -1)
    sin_b = jnp.where(even, 0.0, sin).reshape(1, W)    # coeff of roll(x, +1)

    bm = _pick_block(M, row_block_target, 8)
    tn = _pick_block(W, col_block_target, 128)         # multiple of 128 (or full W): even
    grid = (M // bm, W // tn)

    out = pl.pallas_call(
        _rope_kernel,
        out_shape=jax.ShapeDtypeStruct((M, W), t.dtype),
        grid=grid,
        in_specs=[
            pl.BlockSpec((bm, tn), lambda i, j: (i, j)),   # t tile (lane-dense)
            pl.BlockSpec((1, tn), lambda i, j: (0, j)),    # cos row
            pl.BlockSpec((1, tn), lambda i, j: (0, j)),    # -sin on even cols
            pl.BlockSpec((1, tn), lambda i, j: (0, j)),    # +sin on odd cols
        ],
        out_specs=pl.BlockSpec((bm, tn), lambda i, j: (i, j)),
        compiler_params=pltpu.CompilerParams(
            dimension_semantics=("parallel", "parallel")),
    )(t2, cos, sin_a, sin_b)
    return out.reshape(t.shape)


# ---------------------------------------------------------------------------
# Pure-JAX reference (mirrors the PyTorch forward)
# ---------------------------------------------------------------------------
def _rotate_half_ref(x):
    x1 = x[..., 0::2]
    x2 = x[..., 1::2]
    return jnp.stack((-x2, x1), axis=-1).reshape(x.shape)


def _forward_ref(t, freqs_cos, freqs_sin):
    return t * freqs_cos + _rotate_half_ref(t) * freqs_sin


if __name__ == "__main__":
    # Module config: dim=8 (per-axis rotary dim), pt_seq_len=ft_seq_len=4
    #  -> N = 4*4 = 16 patches, D = 2*dim = 16 rotary features, W = N*D = 256.
    dim, pt_seq_len = 8, 4
    freqs_cos, freqs_sin = build_vision_rope_freqs(dim, pt_seq_len)

    B, H = 2, 3
    N, D = freqs_cos.shape
    key = jax.random.PRNGKey(0)
    t = jax.random.normal(key, (B, H, N, D), dtype=jnp.float32)

    ref = _forward_ref(t, freqs_cos, freqs_sin)

    # Single-tile path (block == full flattened slab).
    out = jax.block_until_ready(vision_rope_apply(t, freqs_cos, freqs_sin))
    assert out.shape == ref.shape and out.dtype == ref.dtype
    assert jnp.allclose(out, ref, atol=1e-5, rtol=1e-5), "mismatch vs reference"

    # Multi-tile path (128-lane column tiles) to exercise the tiled pair swap.
    out_tiled = jax.block_until_ready(
        vision_rope_apply(t, freqs_cos, freqs_sin, col_block_target=128))
    assert jnp.allclose(out_tiled, ref, atol=1e-5, rtol=1e-5), "tiled mismatch"

    print("KERNEL_OK")
</pallas_src>

<mosaic_0001>
module attributes {stable_mosaic.version = 11 : i64} {
  func.func @_rope_kernel(%arg0: i32, %arg1: i32, %arg2: memref<6x256xf32, #tpu.memory_space<vmem>>, %arg3: memref<1x256xf32, #tpu.memory_space<vmem>>, %arg4: memref<1x256xf32, #tpu.memory_space<vmem>>, %arg5: memref<1x256xf32, #tpu.memory_space<vmem>>, %arg6: memref<6x256xf32, #tpu.memory_space<vmem>>) attributes {dimension_semantics = [#tpu.dimension_semantics<parallel>, #tpu.dimension_semantics<parallel>], iteration_bounds = array<i64: 1, 1>, scalar_prefetch = 0 : i64, scratch_operands = 0 : i64, tpu.core_type = #tpu.core_type<tc>, window_params = [{transform_indices = @transform_0, window_bounds = array<i64: 6, 256>}, {transform_indices = @transform_1, window_bounds = array<i64: 1, 256>}, {transform_indices = @transform_2, window_bounds = array<i64: 1, 256>}, {transform_indices = @transform_3, window_bounds = array<i64: 1, 256>}, {transform_indices = @transform_4, window_bounds = array<i64: 6, 256>}]} {
    %c0 = arith.constant 0 : index
    %c0_0 = arith.constant 0 : index
    %0 = vector.load %arg2[%c0, %c0_0] : memref<6x256xf32, #tpu.memory_space<vmem>>, vector<6x256xf32>
    %c255_i32 = arith.constant 255 : i32
    %1 = tpu.dynamic_rotate %0 by %c255_i32 dim 1 : vector<6x256xf32>, i32 -> vector<6x256xf32>
    %c1_i32 = arith.constant 1 : i32
    %2 = tpu.dynamic_rotate %0 by %c1_i32 dim 1 : vector<6x256xf32>, i32 -> vector<6x256xf32>
    %c0_1 = arith.constant 0 : index
    %c0_2 = arith.constant 0 : index
    %3 = vector.load %arg3[%c0_1, %c0_2] : memref<1x256xf32, #tpu.memory_space<vmem>>, vector<1x256xf32>
    %4 = vector.broadcast %3 : vector<1x256xf32> to vector<6x256xf32>
    %5 = arith.mulf %0, %4 : vector<6x256xf32>
    %c0_3 = arith.constant 0 : index
    %c0_4 = arith.constant 0 : index
    %6 = vector.load %arg4[%c0_3, %c0_4] : memref<1x256xf32, #tpu.memory_space<vmem>>, vector<1x256xf32>
    %7 = vector.broadcast %6 : vector<1x256xf32> to vector<6x256xf32>
    %8 = arith.mulf %1, %7 : vector<6x256xf32>
    %9 = arith.addf %5, %8 : vector<6x256xf32>
    %c0_5 = arith.constant 0 : index
    %c0_6 = arith.constant 0 : index
    %10 = vector.load %arg5[%c0_5, %c0_6] : memref<1x256xf32, #tpu.memory_space<vmem>>, vector<1x256xf32>
    %11 = vector.broadcast %10 : vector<1x256xf32> to vector<6x256xf32>
    %12 = arith.mulf %2, %11 : vector<6x256xf32>
    %13 = arith.addf %9, %12 : vector<6x256xf32>
    %c0_7 = arith.constant 0 : index
    %c0_8 = arith.constant 0 : index
    %14 = vector.load %arg6[%c0_7, %c0_8] : memref<6x256xf32, #tpu.memory_space<vmem>>, vector<6x256xf32>
    tpu.vector_store %arg6[%c0_7, %c0_8], %13 {strides = array<i32>} : memref<6x256xf32, #tpu.memory_space<vmem>>, vector<6x256xf32>,
    return
  }
  func.func @transform_0(%arg0: i32, %arg1: i32) -> (i32, i32) {
    %c0_i32 = arith.constant 0 : i32
    return %arg0, %arg1 : i32, i32
  }
  func.func @transform_1(%arg0: i32, %arg1: i32) -> (i32, i32) {
    %c0_i32 = arith.constant 0 : i32
    %c0_i32_0 = arith.constant 0 : i32
    return %c0_i32, %arg1 : i32, i32
  }
  func.func @transform_2(%arg0: i32, %arg1: i32) -> (i32, i32) {
    %c0_i32 = arith.constant 0 : i32
    %c0_i32_0 = arith.constant 0 : i32
    return %c0_i32, %arg1 : i32, i32
  }
  func.func @transform_3(%arg0: i32, %arg1: i32) -> (i32, i32) {
    %c0_i32 = arith.constant 0 : i32
    %c0_i32_0 = arith.constant 0 : i32
    return %c0_i32, %arg1 : i32, i32
  }
  func.func @transform_4(%arg0: i32, %arg1: i32) -> (i32, i32) {
    %c0_i32 = arith.constant 0 : i32
    return %arg0, %arg1 : i32, i32
  }
}

</mosaic_0001>

<bundles_post_ra>
// kernel: tpu_custom_call.1
= control target key start
LH: loop header
LB: loop body
LE: loop exit
PB: predicated region body
PF: predicated region fallthrough
CT: control target
= control target key end

     0   :  { %9 = vsyncpa [#allocation3], 0  ;;  %s225_s0 = inlined_call_operand.hbm [shape: f32[6,256], index: 0, kind: input, shape index: {}]   ;;  %s226_s1 = inlined_call_operand.vmem [shape: f32[1,256], index: 1, kind: input, shape index: {}]   ;;  %s227_s2 = inlined_call_operand.vmem [shape: f32[1,256], index: 2, kind: input, shape index: {}]   ;;  %s228_s3 = inlined_call_operand.vmem [shape: f32[1,256], index: 3, kind: input, shape index: {}]   ;;  %s229_s4 = inlined_call_operand.hbm [shape: f32[6,256], index: 4, kind: output, shape index: {}]  }
   0x1   :  { %10 = vsyncpa [#allocation4], 0  ;;  %s163_s15 = smov [#allocation2]   ;;  %s115_s19 = scalar_lea.hbm %s225_s0, 256 }
   0x2   :  { %s17_s16 = sshll.u32 %s163_s15, 4  ;;  %p116_p0 = scmp.ne.s32.totalorder %s225_s0, %s115_s19  ;;  %s18_s16 = int_to_ptr.vmem [resolvable:$true] %s17_s16 }
   0x3   :  { %p119_p1 = scmp.lt.u32.totalorder %s115_s19, %s225_s0 }
   0x5   :  { %p121_p2 = pnand %p119_p1, %p116_p0 }
   0x7   :  { %124 = shalt.err (!%p121_p2)
}
   0x8   :  { %s125_s24 = scalar_lea.vmem %s18_s16, 256  ;;  %p130_p4 = scmp.lt.s32.totalorder %s18_s16, %s18_s16 }
   0x9   :  { %p126_p3 = scmp.ne.s32.totalorder %s18_s16, %s125_s24  ;;  %p131_p5 = scmp.lt.s32.totalorder %s125_s24, %s125_s24 }
   0xb   :  { %p132_p6 = por %p131_p5, %p130_p4 }
   0xd   :  { %p133_p7 = pnand %p132_p6, %p126_p3 }
   0xf   :  { %136 = shalt.err (!%p133_p7)
}
  0x10   :  { %20 = dma.hbm_to_vmem [thread:$0]  %s225_s0, 256, %s18_s16, [#allocation3]  }
  0x11   :  { %159 = dma.done.wait [#allocation3], 256  }
  0x12   :  { %160 = vsyncadd [#allocation3], 4294967040  ;;  %v30_v0 = vld [vmem:[#allocation2] sm:$0x3f]  ;;  %s164_s27 = smov 1   ;;  %s165_s28 = smov 127   ;;  %v36_v2 = vlaneseq }
  0x13   :  { %41 = vrot.lane.b32.xlu1 %v30_v0, %s164_s27  ;;  %32 = vrot.lane.b32.xlu0 %v30_v0, %s165_s28  ;;  %v31_v1 = vld [vmem:[#allocation2 + $0x8] sm:$0x3f]  ;;  %v48_v6 = vld [vmem:[%s226_s1] sm:$0x3]  ;;  %s166_s1 = smov [#allocation5]  }
  0x14   :  { %v51_v3 = vshrl.u32 %v36_v2, 7  ;;  %v37_v7 = vand.u32 127, %v36_v2  ;;  %v62_v8 = vld [vmem:[%s227_s2] sm:$0x3]  ;;  %s102_s2 = sshll.u32 %s166_s1, 4  ;;  %s103_s2 = int_to_ptr.vmem [resolvable:$true] %s102_s2 }
  0x15   :  { %v78_v13 = vld [vmem:[%s228_s3] sm:$0x3]  ;;  %s137_s3 = scalar_lea.vmem %s103_s2, 256  ;;  %p142_p9 = scmp.lt.s32.totalorder %s103_s2, %s103_s2 }
  0x16   :  { %v52_v4 = vsub.s32 0, %v51_v3  ;;  %v56_v5 = vsub.s32 1, %v51_v3  ;;  %vm45_vm0 = vcmp.lt.s32.totalorder %v37_v7, 1  ;;  %vm38_vm1 = vcmp.lt.s32.totalorder %v37_v7, 127  ;;  %p138_p8 = scmp.ne.s32.totalorder %s103_s2, %s137_s3  ;;  %p143_p10 = scmp.lt.s32.totalorder %s137_s3, %s137_s3 }
  0x17   :  { %43 = vrot.lane.b32.xlu1 %v31_v1, %s164_s27  ;;  %34 = vrot.lane.b32.xlu0 %v31_v1, %s165_s28 }
  0x18   :  { %v53_v9 = vrot.slane %v48_v6, %v52_v4  ;;  %v57_v10 = vrot.slane %v48_v6, %v56_v5  ;;  %v67_v14 = vrot.slane %v62_v8, %v52_v4  ;;  %v71_v15 = vrot.slane %v62_v8, %v56_v5  ;;  %p144_p11 = por %p143_p10, %p142_p9 }
  0x19   :  { %v83_v18 = vrot.slane %v78_v13, %v52_v4  ;;  %v87_v19 = vrot.slane %v78_v13, %v56_v5 }
  0x1a   :  { %v60_v16 = vmul.f32 %v53_v9, %v30_v0  ;;  %v61_v17 = vmul.f32 %v57_v10, %v31_v1  ;;  %p145_p12 = pnand %p144_p11, %p138_p8 }
  0x85   :  { %v42_v11 = vpop.permute.xlu1 %41  ;;  %v33_v12 = vpop.permute.xlu0 %32 }
  0x89   :  { %v44_v20 = vpop.permute.xlu1 %43  ;;  %v35_v21 = vpop.permute.xlu0 %34 }
  0x8a   :  { %v46_v22 = vsel %vm45_vm0, %v42_v11, %v44_v20  ;;  %v47_v23 = vsel %vm45_vm0, %v44_v20, %v42_v11  ;;  %v39_v24 = vsel %vm38_vm1, %v33_v12, %v35_v21  ;;  %v40_v25 = vsel %vm38_vm1, %v35_v21, %v33_v12 }
  0x8b   :  { %v74_v26 = vmul.f32 %v67_v14, %v39_v24  ;;  %v75_v27 = vmul.f32 %v71_v15, %v40_v25  ;;  %v90_v28 = vmul.f32 %v83_v18, %v47_v23  ;;  %v91_v29 = vmul.f32 %v87_v19, %v46_v22 }
  0x8d   :  { %v76_v30 = vadd.f32 %v74_v26, %v60_v16  ;;  %v77_v31 = vadd.f32 %v75_v27, %v61_v17 }
  0x8f   :  { %v92_v32 = vadd.f32 %v90_v28, %v76_v30  ;;  %v93_v33 = vadd.f32 %v91_v29, %v77_v31 }
  0x91   :  { %94 = vst [vmem:[#allocation5] sm:$0x3f] %v92_v32  ;;  %95 = vst [vmem:[#allocation5 + $0x8] sm:$0x3f] %v93_v33 }
  0x92   :  { %148 = shalt.err (!%p145_p12)
}
  0x93   :  { %s149_s10 = scalar_lea.hbm %s229_s4, 256 }
  0x94   :  { %p150_p13 = scmp.ne.s32.totalorder %s229_s4, %s149_s10  ;;  %p153_p0 = scmp.lt.u32.totalorder %s149_s10, %s229_s4 }
  0x96   :  { %p155_p1 = pnand %p153_p0, %p150_p13 }
  0x98   :  { %158 = shalt.err (!%p155_p1)
}
  0x99   :  { %105 = dma.vmem_to_hbm [thread:$0]  %s103_s2, 256, %s229_s4, [#allocation4]  }
  0x9a   :  { %161 = dma.done.wait [#allocation4], 256  }
  0x9b   :  { %162 = vsyncadd [#allocation4], 4294967040 }
  0x9c   :  { %109 = vsyncpa [#allocation3], 1 }
  0x9d   :  { %110 = vsyncpa [#allocation4], 1 }

</bundles_post_ra>
